<compile_context>
chip_gen: v6e
topology: v6e:2x2x1
jax: 0.10.0
libtpu: 0.0.40
codegen_flags: <defaults>
</compile_context>

<pallas_src>
import functools

import jax
import jax.numpy as jnp
from jax.experimental import pallas as pl
from jax.experimental.pallas import tpu as pltpu


def _round_up(v, m):
    return (v + m - 1) // m * m


def _pad2(a, rows, cols):
    return jnp.pad(a, ((0, rows - a.shape[0]), (0, cols - a.shape[1])))


# ---------------------------------------------------------------------------
# Kernel 1: feature projection  P = bf16(X @ W + b).
# Grid = (row tiles, reduction tiles); reduction axis last.
# ---------------------------------------------------------------------------
def _proj_kernel(f_ref, w_ref, b_ref, out_ref, acc_ref):
    k = pl.program_id(1)

    @pl.when(k == 0)
    def _init():
        acc_ref[...] = jnp.zeros_like(acc_ref)

    acc_ref[...] += jnp.dot(f_ref[...].astype(jnp.bfloat16), w_ref[...],
                            preferred_element_type=jnp.float32)

    @pl.when(k == pl.num_programs(1) - 1)
    def _finalize():
        out_ref[...] = (acc_ref[...] + b_ref[...]).astype(out_ref.dtype)


def _project(feat, w, b, *, row_tile=128, k_tile=128):
    """feat: (rows_pad, K_pad) f32, w: (K_pad, Fout_pad) bf16, b: (1, Fout_pad) f32.
    Returns bf16 (rows_pad, Fout_pad) = feat @ w + b."""
    rows_pad, k_pad = feat.shape
    _, fout_pad = w.shape
    grid = (rows_pad // row_tile, k_pad // k_tile)
    flops = 2 * rows_pad * k_pad * fout_pad
    bytes_accessed = (feat.size * feat.dtype.itemsize
                      + grid[0] * w.size * w.dtype.itemsize
                      + rows_pad * fout_pad * 2)

    return pl.pallas_call(
        _proj_kernel,
        out_shape=jax.ShapeDtypeStruct((rows_pad, fout_pad), jnp.bfloat16),
        grid=grid,
        in_specs=[
            pl.BlockSpec((row_tile, k_tile), lambda i, k: (i, k)),    # features
            pl.BlockSpec((k_tile, fout_pad), lambda i, k: (k, 0)),    # weight (bf16)
            pl.BlockSpec((1, fout_pad), lambda i, k: (0, 0)),         # bias (f32)
        ],
        out_specs=pl.BlockSpec((row_tile, fout_pad), lambda i, k: (i, 0)),
        scratch_shapes=[pltpu.VMEM((row_tile, fout_pad), jnp.float32)],
        compiler_params=pltpu.CompilerParams(
            dimension_semantics=("parallel", "arbitrary"),
            vmem_limit_bytes=48 * 1024 * 1024),
        cost_estimate=pl.CostEstimate(flops=int(flops), transcendentals=0,
                                      bytes_accessed=int(bytes_accessed)),
    )(feat, w, b)


# ---------------------------------------------------------------------------
# Kernel 2: incidence aggregation  O = PReLU(alpha, dinv * (H @ P)).
# Grid = (output-row tiles, reduction tiles); reduction axis last.
# ---------------------------------------------------------------------------
def _agg_kernel(h_ref, p_ref, dinv_ref, alpha_ref, out_ref, acc_ref):
    k = pl.program_id(1)

    @pl.when(k == 0)
    def _init():
        acc_ref[...] = jnp.zeros_like(acc_ref)

    acc_ref[...] += jnp.dot(h_ref[...], p_ref[...],
                            preferred_element_type=jnp.float32)

    @pl.when(k == pl.num_programs(1) - 1)
    def _finalize():
        alpha = alpha_ref[0]                          # PReLU slope from SMEM
        pre = acc_ref[...] * dinv_ref[...]            # degree normalization (mean agg)
        out_ref[...] = jnp.where(pre > 0, pre, alpha * pre)


def _aggregate(h, proj, dinv, alpha, *, row_tile=128, k_tile=128):
    """h: (rows_pad, K_pad) bf16 incidence (H or H^T), proj: (K_pad, Fout_pad) bf16,
    dinv: (rows_pad, 1) f32, alpha: (1,) f32 (SMEM).
    Returns f32 (rows_pad, Fout_pad) = PReLU(dinv * (h @ proj))."""
    rows_pad, k_pad = h.shape
    _, fout_pad = proj.shape
    grid = (rows_pad // row_tile, k_pad // k_tile)
    flops = 2 * rows_pad * k_pad * fout_pad
    bytes_accessed = (h.size * h.dtype.itemsize
                      + grid[0] * proj.size * proj.dtype.itemsize
                      + rows_pad * 4
                      + rows_pad * fout_pad * 4)

    return pl.pallas_call(
        _agg_kernel,
        out_shape=jax.ShapeDtypeStruct((rows_pad, fout_pad), jnp.float32),
        grid=grid,
        in_specs=[
            pl.BlockSpec((row_tile, k_tile), lambda i, k: (i, k)),    # incidence tile
            pl.BlockSpec((k_tile, fout_pad), lambda i, k: (k, 0)),    # projected feats
            pl.BlockSpec((row_tile, 1), lambda i, k: (i, 0)),         # 1/deg of out rows
            pl.BlockSpec(memory_space=pltpu.MemorySpace.SMEM),        # PReLU alpha
        ],
        out_specs=pl.BlockSpec((row_tile, fout_pad), lambda i, k: (i, 0)),
        scratch_shapes=[pltpu.VMEM((row_tile, fout_pad), jnp.float32)],
        compiler_params=pltpu.CompilerParams(
            dimension_semantics=("parallel", "arbitrary"),
            vmem_limit_bytes=48 * 1024 * 1024),
        cost_estimate=pl.CostEstimate(flops=int(flops), transcendentals=0,
                                      bytes_accessed=int(bytes_accessed)),
    )(h, proj, dinv, alpha)


# ---------------------------------------------------------------------------
# HGNN forward (num_layers layers); densification/padding glue in plain JAX.
# ---------------------------------------------------------------------------
def hgnn_forward(x, hyperedge_index, num_nodes, num_edges, dropout_rate,
                 layer_params, act_alpha, *, node_tile=128, edge_tile=128):
    # TODO(synk): F.dropout with training=True not implemented; eval mode -> identity.
    del dropout_rate
    edge_dim = layer_params[0]["w1"].shape[1]
    node_dim = layer_params[0]["w2"].shape[1]

    node_idx, edge_idx = hyperedge_index[0], hyperedge_index[1]
    # Dense multiplicity-weighted incidence H (N, E), built once; shipped as both
    # H and H^T in bf16 so both directions are plain MXU matmuls.
    # TODO(synk): exploit sparsity of H (CSR + scalar prefetch) for large hypergraphs.
    h = jnp.zeros((num_nodes, num_edges), jnp.float32).at[node_idx, edge_idx].add(1.0)
    de = h.sum(axis=0)                              # hyperedge degrees
    dn = h.sum(axis=1)                              # node degrees
    de_inv = jnp.where(de > 0, 1.0 / de, 0.0)
    dn_inv = jnp.where(dn > 0, 1.0 / dn, 0.0)

    n_pad = _round_up(num_nodes, node_tile)
    e_pad = _round_up(num_edges, edge_tile)
    fin_pad = _round_up(x.shape[1], 128)
    fe_pad = _round_up(edge_dim, 128)
    fn_pad = _round_up(node_dim, 128)

    h_p = _pad2(h, n_pad, e_pad).astype(jnp.bfloat16)            # (N_pad, E_pad)
    ht_p = _pad2(h.T, e_pad, n_pad).astype(jnp.bfloat16)         # (E_pad, N_pad)
    de_inv_p = _pad2(de_inv[:, None], e_pad, 1).astype(jnp.float32)
    dn_inv_p = _pad2(dn_inv[:, None], n_pad, 1).astype(jnp.float32)
    feat = _pad2(x.astype(jnp.float32), n_pad, fin_pad)

    act_a = jnp.asarray(act_alpha, jnp.float32).reshape(1)
    e = None
    for lp in layer_params:
        w1 = _pad2(lp["w1"], feat.shape[1], fe_pad).astype(jnp.bfloat16)
        b1 = _pad2(lp["b1"], 1, fe_pad).astype(jnp.float32)
        w2 = _pad2(lp["w2"], fe_pad, fn_pad).astype(jnp.bfloat16)
        b2 = _pad2(lp["b2"], 1, fn_pad).astype(jnp.float32)
        a_conv = jnp.asarray(lp["a_conv"], jnp.float32).reshape(1)

        # node -> hyperedge (conv-internal PReLU)
        xw = _project(feat, w1, b1, row_tile=node_tile, k_tile=128)
        e = _aggregate(ht_p, xw, de_inv_p, a_conv,
                       row_tile=edge_tile, k_tile=node_tile)
        # hyperedge -> node (+ shared outer HGNN PReLU)
        ew = _project(e, w2, b2, row_tile=edge_tile, k_tile=128)
        feat = _aggregate(h_p, ew, dn_inv_p, act_a,
                          row_tile=node_tile, k_tile=edge_tile)

    return feat[:num_nodes, :node_dim], e[:num_edges, :edge_dim]


# ---------------------------------------------------------------------------
# Pure-JAX references (bf16-matched and full-f32).
# ---------------------------------------------------------------------------
def ref_forward(x, hyperedge_index, num_nodes, num_edges, layer_params, act_alpha,
                *, use_bf16=True):
    node_idx, edge_idx = hyperedge_index[0], hyperedge_index[1]
    h = jnp.zeros((num_nodes, num_edges), jnp.float32).at[node_idx, edge_idx].add(1.0)
    de_inv = jnp.where(h.sum(0) > 0, 1.0 / h.sum(0), 0.0)[:, None]   # (E,1)
    dn_inv = jnp.where(h.sum(1) > 0, 1.0 / h.sum(1), 0.0)[:, None]   # (N,1)
    mm = jnp.bfloat16 if use_bf16 else jnp.float32
    hc = h.astype(mm)
    e = None
    for lp in layer_params:
        w1 = lp["w1"].astype(mm)
        w2 = lp["w2"].astype(mm)
        xw = jnp.dot(x.astype(mm), w1, preferred_element_type=jnp.float32) + lp["b1"]
        e_pre = de_inv * jnp.dot(hc.T, xw.astype(mm), preferred_element_type=jnp.float32)
        ac = jnp.asarray(lp["a_conv"]).reshape(())
        e = jnp.where(e_pre > 0, e_pre, ac * e_pre)
        ew = jnp.dot(e.astype(mm), w2, preferred_element_type=jnp.float32) + lp["b2"]
        n_pre = dn_inv * jnp.dot(hc, ew.astype(mm), preferred_element_type=jnp.float32)
        ao = jnp.asarray(act_alpha).reshape(())
        x = jnp.where(n_pre > 0, n_pre, ao * n_pre)
    return x, e


def init_params(key, in_dim, edge_dim, node_dim, num_layers):
    layers = []
    dims_in = [in_dim] + [node_dim] * (num_layers - 1)
    for fi in dims_in:
        k1, k2, k3, k4, key = jax.random.split(key, 5)
        layers.append({
            "w1": jax.random.uniform(k1, (fi, edge_dim), jnp.float32, -1.0, 1.0) / jnp.sqrt(fi),
            "b1": jax.random.uniform(k2, (1, edge_dim), jnp.float32, -1.0, 1.0) / jnp.sqrt(fi),
            "w2": jax.random.uniform(k3, (edge_dim, node_dim), jnp.float32, -1.0, 1.0) / jnp.sqrt(edge_dim),
            "b2": jax.random.uniform(k4, (1, node_dim), jnp.float32, -1.0, 1.0) / jnp.sqrt(edge_dim),
            "a_conv": jnp.full((1,), 0.25, jnp.float32),   # per-conv PReLU slope
        })
    act_alpha = jnp.full((1,), 0.25, jnp.float32)          # shared outer PReLU (HGNN.act)
    return layers, act_alpha


if __name__ == "__main__":
    key = jax.random.PRNGKey(0)
    num_nodes, num_edges = 48, 20          # deliberately not 8/128-aligned -> exercises padding
    in_dim, edge_dim, node_dim = 12, 32, 32
    num_layers = 2
    nnz = 160

    k_x, k_ni, k_ei, k_p = jax.random.split(key, 4)
    x = jax.random.normal(k_x, (num_nodes, in_dim), jnp.float32)
    hyperedge_index = jnp.stack([
        jax.random.randint(k_ni, (nnz,), 0, num_nodes),
        jax.random.randint(k_ei, (nnz,), 0, num_edges),
    ], axis=0)                             # (2, nnz) like PyTorch
    layer_params, act_alpha = init_params(k_p, in_dim, edge_dim, node_dim, num_layers)

    n_out, e_out = hgnn_forward(x, hyperedge_index, num_nodes, num_edges, 0.0,
                                layer_params, act_alpha)
    n_out = jax.block_until_ready(n_out)
    e_out = jax.block_until_ready(e_out)
    assert n_out.shape == (num_nodes, node_dim)
    assert e_out.shape == (num_edges, edge_dim)

    # Tight check vs a reference using the exact same bf16 casting as the kernels.
    n_ref, e_ref = ref_forward(x, hyperedge_index, num_nodes, num_edges,
                               layer_params, act_alpha, use_bf16=True)
    assert jnp.allclose(n_out, n_ref, atol=2e-3, rtol=2e-3), \
        float(jnp.max(jnp.abs(n_out - n_ref)))
    assert jnp.allclose(e_out, e_ref, atol=2e-3, rtol=2e-3), \
        float(jnp.max(jnp.abs(e_out - e_ref)))

    # Loose sanity check vs a full-f32 reference (bf16 MXU error budget).
    n32, e32 = ref_forward(x, hyperedge_index, num_nodes, num_edges,
                           layer_params, act_alpha, use_bf16=False)
    assert jnp.allclose(n_out, n32, atol=5e-2, rtol=5e-2)
    assert jnp.allclose(e_out, e32, atol=5e-2, rtol=5e-2)

    print("KERNEL_OK")
</pallas_src>

<mosaic_0001>
module attributes {stable_mosaic.version = 11 : i64} {
  func.func @_proj_kernel(%arg0: i32, %arg1: i32, %arg2: memref<128x128xf32, #tpu.memory_space<vmem>>, %arg3: memref<128x128xbf16, #tpu.memory_space<vmem>>, %arg4: memref<1x128xf32, #tpu.memory_space<vmem>>, %arg5: memref<128x128xbf16, #tpu.memory_space<vmem>>, %arg6: memref<128x128xf32, #tpu.memory_space<vmem>>) attributes {dimension_semantics = [#tpu.dimension_semantics<parallel>, #tpu.dimension_semantics<arbitrary>], iteration_bounds = array<i64: 1, 1>, scalar_prefetch = 0 : i64, scratch_operands = 1 : i64, tpu.core_type = #tpu.core_type<tc>, window_params = [{transform_indices = @transform_0, window_bounds = array<i64: 128, 128>}, {transform_indices = @transform_1, window_bounds = array<i64: 128, 128>}, {pipeline_mode = #tpu.pipeline_mode<synchronous>, transform_indices = @transform_2, window_bounds = array<i64: 1, 128>}, {transform_indices = @transform_3, window_bounds = array<i64: 128, 128>}]} {
    %c0_i32 = arith.constant 0 : i32
    %0 = arith.cmpi eq, %arg1, %c0_i32 : i32
    %1 = arith.extui %0 : i1 to i32
    %c0_i32_0 = arith.constant 0 : i32
    %2 = arith.cmpi ne, %1, %c0_i32_0 : i32
    scf.if %2 {
      %cst_10 = arith.constant 0.000000e+00 : f32
      %13 = vector.broadcast %cst_10 : f32 to vector<128x128xf32>
      %c0_11 = arith.constant 0 : index
      %c0_12 = arith.constant 0 : index
      %14 = vector.load %arg6[%c0_11, %c0_12] : memref<128x128xf32, #tpu.memory_space<vmem>>, vector<128x128xf32>
      tpu.vector_store %arg6[%c0_11, %c0_12], %13 {strides = array<i32>} : memref<128x128xf32, #tpu.memory_space<vmem>>, vector<128x128xf32>,
    } else {
    }
    %c0 = arith.constant 0 : index
    %c0_1 = arith.constant 0 : index
    %3 = vector.load %arg6[%c0, %c0_1] : memref<128x128xf32, #tpu.memory_space<vmem>>, vector<128x128xf32>
    %c0_2 = arith.constant 0 : index
    %c0_3 = arith.constant 0 : index
    %4 = vector.load %arg2[%c0_2, %c0_3] : memref<128x128xf32, #tpu.memory_space<vmem>>, vector<128x128xf32>
    %5 = arith.truncf %4 : vector<128x128xf32> to vector<128x128xbf16>
    %c0_4 = arith.constant 0 : index
    %c0_5 = arith.constant 0 : index
    %6 = vector.load %arg3[%c0_4, %c0_5] : memref<128x128xbf16, #tpu.memory_space<vmem>>, vector<128x128xbf16>
    %cst = arith.constant dense<0.000000e+00> : vector<128x128xf32>
    %7 = tpu.matmul %5, %6, %cst {dimension_numbers = #tpu.dot_dimension_numbers<[1], [0], [0], [1], [0, 0, 1, 1], [], []>} : vector<128x128xbf16>, vector<128x128xbf16>, vector<128x128xf32> -> vector<128x128xf32>
    %8 = arith.addf %3, %7 : vector<128x128xf32>
    %c0_6 = arith.constant 0 : index
    %c0_7 = arith.constant 0 : index
    %9 = vector.load %arg6[%c0_6, %c0_7] : memref<128x128xf32, #tpu.memory_space<vmem>>, vector<128x128xf32>
    tpu.vector_store %arg6[%c0_6, %c0_7], %8 {strides = array<i32>} : memref<128x128xf32, #tpu.memory_space<vmem>>, vector<128x128xf32>,
    %c0_i32_8 = arith.constant 0 : i32
    %10 = arith.cmpi eq, %arg1, %c0_i32_8 : i32
    %11 = arith.extui %10 : i1 to i32
    %c0_i32_9 = arith.constant 0 : i32
    %12 = arith.cmpi ne, %11, %c0_i32_9 : i32
    scf.if %12 {
      %c0_10 = arith.constant 0 : index
      %c0_11 = arith.constant 0 : index
      %13 = vector.load %arg6[%c0_10, %c0_11] : memref<128x128xf32, #tpu.memory_space<vmem>>, vector<128x128xf32>
      %c0_12 = arith.constant 0 : index
      %c0_13 = arith.constant 0 : index
      %14 = vector.load %arg4[%c0_12, %c0_13] : memref<1x128xf32, #tpu.memory_space<vmem>>, vector<1x128xf32>
      %15 = vector.broadcast %14 : vector<1x128xf32> to vector<128x128xf32>
      %16 = arith.addf %13, %15 : vector<128x128xf32>
      %17 = arith.truncf %16 : vector<128x128xf32> to vector<128x128xbf16>
      %c0_14 = arith.constant 0 : index
      %c0_15 = arith.constant 0 : index
      %18 = vector.load %arg5[%c0_14, %c0_15] : memref<128x128xbf16, #tpu.memory_space<vmem>>, vector<128x128xbf16>
      tpu.vector_store %arg5[%c0_14, %c0_15], %17 {strides = array<i32>} : memref<128x128xbf16, #tpu.memory_space<vmem>>, vector<128x128xbf16>,
    } else {
    }
    return
  }
  func.func @transform_0(%arg0: i32, %arg1: i32) -> (i32, i32) {
    %c0_i32 = arith.constant 0 : i32
    return %arg0, %arg1 : i32, i32
  }
  func.func @transform_1(%arg0: i32, %arg1: i32) -> (i32, i32) {
    %c0_i32 = arith.constant 0 : i32
    %c0_i32_0 = arith.constant 0 : i32
    return %arg1, %c0_i32 : i32, i32
  }
  func.func @transform_2(%arg0: i32, %arg1: i32) -> (i32, i32) {
    %c0_i32 = arith.constant 0 : i32
    %c0_i32_0 = arith.constant 0 : i32
    %c0_i32_1 = arith.constant 0 : i32
    return %c0_i32, %c0_i32_0 : i32, i32
  }
  func.func @transform_3(%arg0: i32, %arg1: i32) -> (i32, i32) {
    %c0_i32 = arith.constant 0 : i32
    %c0_i32_0 = arith.constant 0 : i32
    return %arg0, %c0_i32 : i32, i32
  }
}

</mosaic_0001>

<bundles_post_ra>
// kernel: tpu_custom_call.1
= control target key start
LH: loop header
LB: loop body
LE: loop exit
PB: predicated region body
PF: predicated region fallthrough
CT: control target
= control target key end

     0   :  { %8 = vsyncpa [#allocation4], 0  ;;  %s715_s0 = inlined_call_operand.hbm [shape: f32[128,128], index: 0, kind: input, shape index: {}]   ;;  %s716_s1 = inlined_call_operand.hbm [shape: bf16[128,128], index: 1, kind: input, shape index: {}]   ;;  %s717_s2 = inlined_call_operand.vmem [shape: f32[1,128], index: 2, kind: input, shape index: {}]   ;;  %s718_s3 = inlined_call_operand.hbm [shape: bf16[128,128], index: 3, kind: output, shape index: {}]  }
   0x1   :  { %9 = vsyncpa [#allocation7], 0 }
   0x2   :  { %10 = vsyncpa [#allocation5], 0  ;;  %s670_s12 = smov [#allocation3]  }
   0x3   :  { %s16_s13 = sshll.u32 %s670_s12, 4  ;;  %s17_s13 = int_to_ptr.vmem [resolvable:$true] %s16_s13 }
   0x4   :  { %s612_s14 = scalar_lea.vmem %s17_s13, 2048  ;;  %p617_p1 = scmp.lt.s32.totalorder %s17_s13, %s17_s13 }
   0x5   :  { %p613_p0 = scmp.ne.s32.totalorder %s17_s13, %s612_s14  ;;  %p618_p2 = scmp.lt.s32.totalorder %s612_s14, %s612_s14 }
   0x7   :  { %p619_p3 = por %p618_p2, %p617_p1 }
   0x9   :  { %p620_p4 = pnand %p619_p3, %p613_p0 }
   0xb   :  { %623 = shalt.err (!%p620_p4)
}
   0xc   :  { %s671_s15 = smov 128   ;;  %s672_s16 = smov 8  }
   0xd   :  { %22 = dma.hbm_to_vmem [thread:$0]  %s715_s0, 2048, %s17_s13, [#allocation4], %s671_s15, %s671_s15, %s672_s16  }
   0xe   :  { %s673_s19 = smov [#allocation6]  }
   0xf   :  { %s28_s20 = sshll.u32 %s673_s19, 4  ;;  %s29_s20 = int_to_ptr.vmem [resolvable:$true] %s28_s20 }
  0x10   :  { %s632_s21 = scalar_lea.vmem %s29_s20, 1024  ;;  %p637_p6 = scmp.lt.s32.totalorder %s29_s20, %s29_s20 }
  0x11   :  { %p633_p5 = scmp.ne.s32.totalorder %s29_s20, %s632_s21  ;;  %p638_p7 = scmp.lt.s32.totalorder %s632_s21, %s632_s21 }
  0x13   :  { %p639_p8 = por %p638_p7, %p637_p6 }
  0x15   :  { %p640_p9 = pnand %p639_p8, %p633_p5 }
  0x17   :  { %643 = shalt.err (!%p640_p9)
}
  0x18   :  { %s674_s22 = smov 64   ;;  %s675_s23 = smov 4  }
  0x19   :  { %34 = dma.hbm_to_vmem [thread:$0]  %s716_s1, 1024, %s29_s20, [#allocation7], %s674_s22, %s674_s22, %s675_s23  }
  0x1a   :  { %664 = dma.done.wait [#allocation4], 2048  }
  0x1b   :  { %665 = vsyncadd [#allocation4], 4294965248 }
  0x1c   :  { %666 = dma.done.wait [#allocation7], 1024  }
  0x1d   :  { %667 = vsyncadd [#allocation7], 4294966272  ;;  %v596_v0 = vld [vmem:[#allocation6 + $0x38] sm:$0xff]   ;;  %v597_v1 = vld [vmem:[#allocation6 + $0x30] sm:$0xff]  }
  0x1e   :  { %541 = vmatprep.subr.bf16.mxu0 %v596_v0  ;;  %573 = vmatprep.subr.bf16.mxu1 %v596_v0  ;;  %v598_v2 = vld [vmem:[#allocation6 + $0x28] sm:$0xff]   ;;  %v599_v3 = vld [vmem:[#allocation6 + $0x20] sm:$0xff]   ;;  %v600_v10 = vld [vmem:[#allocation6 + $0x18] sm:$0xff]  }
  0x1f   :  { %542 = vmatpush3.bf16.msra.mxu0 %v596_v0  ;;  %581 = vmatpush3.bf16.msra.mxu1 %v596_v0  ;;  %v80_v4 = vld [vmem:[#allocation3] sm:$0xff]  ;;  %v81_v5 = vld [vmem:[#allocation3 + $0x8] sm:$0xff]  ;;  %v601_v11 = vld [vmem:[#allocation6 + $0x10] sm:$0xff]  }
  0x20   :  { %543 = vmatprep.subr.bf16.mxu0 %v597_v1  ;;  %574 = vmatprep.subr.bf16.mxu1 %v597_v1  ;;  %v88_v6 = vld [vmem:[#allocation3 + $0x40] sm:$0xff]  ;;  %v96_v7 = vpack.c.bf16 %v81_v5, %v80_v4  ;;  %v89_v8 = vld [vmem:[#allocation3 + $0x48] sm:$0xff]  ;;  %v82_v14 = vld [vmem:[#allocation3 + $0x10] sm:$0xff] }
  0x21   :  { %v100_v9 = vpack.c.bf16 %v89_v8, %v88_v6  ;;  %v602_v12 = vld [vmem:[#allocation6 + $0x8] sm:$0xff]   ;;  %v603_v13 = vld [vmem:[#allocation6] sm:$0xff]   ;;  %v83_v15 = vld [vmem:[#allocation3 + $0x18] sm:$0xff] }
  0x22   :  { %557 = vmatprep.mubr.bf16.mxu0 %v96_v7  ;;  %v90_v16 = vld [vmem:[#allocation3 + $0x50] sm:$0xff]  ;;  %v91_v17 = vld [vmem:[#allocation3 + $0x58] sm:$0xff]  ;;  %v84_v18 = vld [vmem:[#allocation3 + $0x20] sm:$0xff]  ;;  %v97_v22 = vpack.c.bf16 %v83_v15, %v82_v14 }
  0x23   :  { %544 = vmatpush3.bf16.msra.mxu0 %v597_v1  ;;  %582 = vmatpush3.bf16.msra.mxu1 %v597_v1  ;;  %v85_v19 = vld [vmem:[#allocation3 + $0x28] sm:$0xff]  ;;  %v92_v20 = vld [vmem:[#allocation3 + $0x60] sm:$0xff]  ;;  %v101_v23 = vpack.c.bf16 %v91_v17, %v90_v16  ;;  %v86_v26 = vld [vmem:[#allocation3 + $0x30] sm:$0xff] }
  0x24   :  { %545 = vmatprep.subr.bf16.mxu0 %v598_v2  ;;  %575 = vmatprep.subr.bf16.mxu1 %v598_v2  ;;  %v93_v21 = vld [vmem:[#allocation3 + $0x68] sm:$0xff]  ;;  %v98_v24 = vpack.c.bf16 %v85_v19, %v84_v18  ;;  %v87_v27 = vld [vmem:[#allocation3 + $0x38] sm:$0xff]  ;;  %v94_v28 = vld [vmem:[#allocation3 + $0x70] sm:$0xff] }
  0x25   :  { %565 = vmatprep.mubr.bf16.mxu1 %v100_v9  ;;  %v102_v25 = vpack.c.bf16 %v93_v21, %v92_v20  ;;  %v95_v29 = vld [vmem:[#allocation3 + $0x78] sm:$0xff]  ;;  %v99_v30 = vpack.c.bf16 %v87_v27, %v86_v26  ;;  %v445_v34 = vld [vmem:[%s717_s2] ss:$0 sm:$0xff]  ;;  %s676_s2 = smov [#allocation8]  }
  0x26   :  { %v103_v31 = vpack.c.bf16 %v95_v29, %v94_v28  ;;  %s424_s26 = sshll.u32 %s676_s2, 4  ;;  %s425_s26 = int_to_ptr.vmem [resolvable:$true] %s424_s26 }
  0x27   :  { %546 = vmatpush3.bf16.msra.mxu0 %v598_v2  ;;  %583 = vmatpush3.bf16.msra.mxu1 %v598_v2  ;;  %s644_s27 = scalar_lea.vmem %s425_s26, 1024  ;;  %p649_p11 = scmp.lt.s32.totalorder %s425_s26, %s425_s26 }
  0x28   :  { %547 = vmatprep.subr.bf16.mxu0 %v599_v3  ;;  %576 = vmatprep.subr.bf16.mxu1 %v599_v3  ;;  %p645_p10 = scmp.ne.s32.totalorder %s425_s26, %s644_s27  ;;  %p650_p12 = scmp.lt.s32.totalorder %s644_s27, %s644_s27 }
  0x2a   :  { %p651_p13 = por %p650_p12, %p649_p11 }
  0x2b   :  { %548 = vmatpush3.bf16.msra.mxu0 %v599_v3  ;;  %584 = vmatpush3.bf16.msra.mxu1 %v599_v3 }
  0x2c   :  { %549 = vmatprep.subr.bf16.mxu0 %v600_v10  ;;  %577 = vmatprep.subr.bf16.mxu1 %v600_v10  ;;  %p652_p0 = pnand %p651_p13, %p645_p10 }
  0x2f   :  { %550 = vmatpush3.bf16.msra.mxu0 %v600_v10  ;;  %585 = vmatpush3.bf16.msra.mxu1 %v600_v10 }
  0x30   :  { %551 = vmatprep.subr.bf16.mxu0 %v601_v11  ;;  %578 = vmatprep.subr.bf16.mxu1 %v601_v11 }
  0x33   :  { %552 = vmatpush3.bf16.msra.mxu0 %v601_v11  ;;  %586 = vmatpush3.bf16.msra.mxu1 %v601_v11 }
  0x34   :  { %553 = vmatprep.subr.bf16.mxu0 %v602_v12  ;;  %579 = vmatprep.subr.bf16.mxu1 %v602_v12 }
  0x37   :  { %554 = vmatpush3.bf16.msra.mxu0 %v602_v12  ;;  %587 = vmatpush3.bf16.msra.mxu1 %v602_v12 }
  0x38   :  { %555 = vmatprep.subr.bf16.mxu0 %v603_v13  ;;  %580 = vmatprep.subr.bf16.mxu1 %v603_v13 }
  0x3b   :  { %556 = vmatpush3.bf16.msra.mxu0 %v603_v13  ;;  %588 = vmatpush3.bf16.msra.mxu1 %v603_v13 }
  0x3e   :  { %558 = vmatmul.mubr.bf16.vlgmr.msra.gmra.mxu0 %v97_v22  ;;  %566 = vmatmul.mubr.bf16.vlgmr.msra.gmra.mxu1 %v101_v23 }
  0x3f   :  { %561 = vmatprep.mubr.bf16.mxu0 %v98_v24  ;;  %569 = vmatprep.mubr.bf16.mxu1 %v102_v25 }
  0x46   :  { %562 = vmatmul.mubr.bf16.gmra.mxu0 %v99_v30  ;;  %570 = vmatmul.mubr.bf16.gmra.mxu1 %v103_v31 }
  0xfe   :  { %v559_v32 = vpop.f32.mrf.mxu0  ;;  %v567_v33 = vpop.f32.mrf.mxu1 }
  0xff   :  { %v325_v39 = vadd.f32 %v559_v32, %v445_v34  ;;  %v333_v40 = vadd.f32 %v567_v33, %v445_v34 }
 0x100   :  { %v202_v35 = vpop.f32.mrf.mxu0  ;;  %v234_v36 = vpop.f32.mrf.mxu1 }
 0x101   :  { %v323_v43 = vadd.f32 %v445_v34, %v202_v35  ;;  %v331_v44 = vadd.f32 %v445_v34, %v234_v36 }
 0x102   :  { %v560_v37 = vpop.f32.mrf.mxu0  ;;  %v568_v38 = vpop.f32.mrf.mxu1 }
 0x103   :  { %v326_v41 = vadd.f32 %v560_v37, %v445_v34  ;;  %v334_v42 = vadd.f32 %v568_v38, %v445_v34 }
 0x104   :  { %v205_v45 = vpop.f32.mrf.mxu0  ;;  %v237_v46 = vpop.f32.mrf.mxu1 }
 0x105   :  { %v486_v47 = vpack.c.bf16 %v326_v41, %v325_v39  ;;  %v506_v48 = vpack.c.bf16 %v334_v42, %v333_v40  ;;  %v324_v49 = vadd.f32 %v445_v34, %v205_v45  ;;  %v332_v50 = vadd.f32 %v445_v34, %v237_v46 }
 0x106   :  { %v563_v51 = vpop.f32.mrf.mxu0  ;;  %v571_v52 = vpop.f32.mrf.mxu1 }
 0x107   :  { %518 = vst [vmem:[#allocation8 + $0x8] sm:$0xff] %v486_v47   ;;  %522 = vst [vmem:[#allocation8 + $0x28] sm:$0xff] %v506_v48   ;;  %v481_v53 = vpack.c.bf16 %v324_v49, %v323_v43  ;;  %v501_v54 = vpack.c.bf16 %v332_v50, %v331_v44  ;;  %v329_v59 = vadd.f32 %v563_v51, %v445_v34 }
 0x108   :  { %v218_v55 = vpop.f32.mrf.mxu0  ;;  %v250_v56 = vpop.f32.mrf.mxu1  ;;  %v337_v60 = vadd.f32 %v571_v52, %v445_v34 }
 0x109   :  { %482 = vst [vmem:[#allocation8] sm:$0xff] %v481_v53   ;;  %521 = vst [vmem:[#allocation8 + $0x20] sm:$0xff] %v501_v54   ;;  %v327_v63 = vadd.f32 %v445_v34, %v218_v55  ;;  %v335_v0 = vadd.f32 %v445_v34, %v250_v56 }
 0x10a   :  { %v564_v57 = vpop.f32.mrf.mxu0  ;;  %v572_v58 = vpop.f32.mrf.mxu1 }
 0x10b   :  { %v330_v61 = vadd.f32 %v564_v57, %v445_v34  ;;  %v338_v62 = vadd.f32 %v572_v58, %v445_v34 }
 0x10c   :  { %v221_v1 = vpop.f32.mrf.mxu0  ;;  %v253_v2 = vpop.f32.mrf.mxu1 }
 0x10d   :  { %v496_v3 = vpack.c.bf16 %v330_v61, %v329_v59  ;;  %v516_v4 = vpack.c.bf16 %v338_v62, %v337_v60  ;;  %v328_v5 = vadd.f32 %v445_v34, %v221_v1  ;;  %v336_v6 = vadd.f32 %v445_v34, %v253_v2 }
 0x10f   :  { %520 = vst [vmem:[#allocation8 + $0x18] sm:$0xff] %v496_v3   ;;  %524 = vst [vmem:[#allocation8 + $0x38] sm:$0xff] %v516_v4   ;;  %v491_v7 = vpack.c.bf16 %v328_v5, %v327_v63  ;;  %v511_v8 = vpack.c.bf16 %v336_v6, %v335_v0 }
 0x111   :  { %519 = vst [vmem:[#allocation8 + $0x10] sm:$0xff] %v491_v7   ;;  %523 = vst [vmem:[#allocation8 + $0x30] sm:$0xff] %v511_v8  }
 0x112   :  { %655 = shalt.err (!%p652_p0)
}
 0x113   :  { %430 = dma.vmem_to_hbm [thread:$0]  %s425_s26, 1024, %s718_s3, [#allocation5], %s674_s22, %s674_s22, %s675_s23  }
 0x114   :  { %668 = dma.done.wait [#allocation5], 1024  }
 0x115   :  { %669 = vsyncadd [#allocation5], 4294966272 }
 0x116   :  { %434 = vsyncpa [#allocation4], 1 }
 0x117   :  { %435 = vsyncpa [#allocation7], 1 }
 0x118   :  { %436 = vsyncpa [#allocation5], 1 }

</bundles_post_ra>
